<compile_context>
chip_gen: v6e
topology: v6e:2x2x1
jax: 0.10.0
libtpu: 0.0.40
codegen_flags: <defaults>
</compile_context>

<pallas_src>
import jax
import jax.numpy as jnp
from jax.experimental import pallas as pl
from jax.experimental.pallas import tpu as pltpu


def _add_pe_kernel(x_ref, pe_ref, o_ref):
    # 3-D path: x_ref/o_ref (TS, B, D), pe_ref (TS, D) -> broadcast over batch.
    # 2-D path: x_ref/o_ref (TS, B*D), pe_ref (TS, B*D) -> plain add.
    x = x_ref[...].astype(jnp.float32)
    pe = pe_ref[...]
    if x_ref.ndim == 3:
        pe = pe[:, None, :]          # (TS, 1, D): broadcast over batch sublanes
    o_ref[...] = (x + pe).astype(o_ref.dtype)


def _choose_seq_tile(s, bytes_per_row, *, sublane=1,
                     max_block_bytes=12 << 20, min_grid=2):
    """Pick a sequence tile TS that divides s.

    `bytes_per_row` is the per-seq-row VMEM footprint of one pipeline stage
    (x + pe + out); double-buffering doubles it, so max_block_bytes=12 MiB
    keeps scoped VMEM under ~24 MiB.  `sublane` is the dtype-aware sublane
    quantum (only constrains the flattened 2-D path).  Prefers the largest
    tile whose grid is even and >= min_grid (keeps both v7x TCs busy), then
    >= min_grid, then simply the largest that fits.
    """
    divs = [t for t in range(1, s + 1) if s % t == 0]
    legal = [t for t in divs if t % sublane == 0 or t == s] or [s]
    fits = [t for t in legal if t * bytes_per_row <= max_block_bytes]
    if not fits:
        # TODO(synk): a single row wider than the budget needs a second grid
        # axis over the lane dimension; fall back to the smallest legal tile.
        fits = [min(legal)]
    fits.sort(reverse=True)
    for t in fits:
        n = s // t
        if n >= min_grid and n % 2 == 0:
            return t
    for t in fits:
        if s // t >= min_grid:
            return t
    return fits[0]


def sinusoidal_encoding(x, *, base=10000, max_length=1024, seq_tile=None,
                        donate_x=False):
    """x: (seq_len, batch, dim). Returns x + pe[:seq_len], with
    pe = concat([sin(t*inv_freq), cos(t*inv_freq)], -1) as in the module."""
    s, b, d = x.shape
    assert d % 2 == 0, "dim must be even"
    assert s <= max_length, "seq_len exceeds max_length of the PE buffer"

    # PE buffer computed exactly like the module's registered buffer,
    # sliced to the current seq_len: shape (S, D), float32.
    inv_freq = 1.0 / (base ** (jnp.arange(0, d, 2, dtype=jnp.float32) / d))
    freqs = jnp.outer(jnp.arange(s, dtype=jnp.float32), inv_freq)     # (S, D//2)
    pe = jnp.concatenate([jnp.sin(freqs), jnp.cos(freqs)], axis=-1)   # (S, D)

    itemsize = x.dtype.itemsize

    if d >= 128:
        # Lane-dense already: keep (S, B, D) and broadcast the (TS, D) PE slab
        # over the batch sublane axis inside the kernel (PE traffic = x_bytes/B).
        x_in, pe_in = x, pe
        pe_row = d * 4
        sublane = 1                     # last two block dims equal full (B, D)
    else:
        # Narrow feature dim: flatten to (S, B*D) so stores stay lane-dense;
        # PE pre-tiled over the batch (acceptable extra traffic only here).
        x_in = x.reshape(s, b * d)
        pe_in = jnp.tile(pe, (1, b))                                  # (S, B*D)
        pe_row = b * d * 4
        sublane = max(8, 32 // itemsize)   # dtype-aware: 8 f32 / 16 bf16 / 32 i8

    x_row = b * d * itemsize
    if seq_tile is None:
        seq_tile = _choose_seq_tile(s, 2 * x_row + pe_row, sublane=sublane)
    assert s % seq_tile == 0
    grid = (s // seq_tile,)

    x_bshape = (seq_tile,) + x_in.shape[1:]
    pe_bshape = (seq_tile,) + pe_in.shape[1:]
    x_imap = (lambda i: (i, 0, 0)) if x_in.ndim == 3 else (lambda i: (i, 0))
    pe_imap = lambda i: (i, 0)

    cost = pl.CostEstimate(
        flops=2 * s * b * d,                        # add (+ cast)
        transcendentals=0,                          # PE is precomputed
        bytes_accessed=2 * s * b * d * itemsize + s * pe_row,
    )

    out = pl.pallas_call(
        _add_pe_kernel,
        out_shape=jax.ShapeDtypeStruct(x_in.shape, x.dtype),
        grid_spec=pltpu.PrefetchScalarGridSpec(
            num_scalar_prefetch=0,
            grid=grid,
            in_specs=[
                pl.BlockSpec(x_bshape, x_imap),
                pl.BlockSpec(pe_bshape, pe_imap),
            ],
            out_specs=pl.BlockSpec(x_bshape, x_imap),
        ),
        compiler_params=pltpu.CompilerParams(
            dimension_semantics=("parallel",),
            vmem_limit_bytes=40 << 20,   # > scoped defaults, safe on v7x (64 MiB/TC)
        ),
        cost_estimate=cost,
        input_output_aliases=({0: 0} if donate_x else {}),
    )(x_in, pe_in)

    return out.reshape(s, b, d)


def _reference(x, base=10000):
    s, _, d = x.shape
    inv_freq = 1.0 / (base ** (jnp.arange(0, d, 2, dtype=jnp.float32) / d))
    t = jnp.arange(s, dtype=jnp.float32)
    freqs = jnp.outer(t, inv_freq)[:, None, :]
    pe = jnp.concatenate([jnp.sin(freqs), jnp.cos(freqs)], axis=-1)
    return x + pe


if __name__ == "__main__":
    key = jax.random.PRNGKey(0)

    # Small shape consistent with the module's forward: (seq, batch, dim).
    # D < 128 -> lane-dense flattened path.
    seq, batch, dim = 8, 2, 32
    x = jax.random.normal(key, (seq, batch, dim), dtype=jnp.float32)
    out = jax.block_until_ready(sinusoidal_encoding(x))
    assert out.shape == x.shape
    assert jnp.allclose(out, _reference(x), atol=1e-3, rtol=1e-3)

    # D >= 128 -> 3-D broadcast-add path, 2-step pipelined grid.
    x2 = jax.random.normal(jax.random.PRNGKey(0), (64, 4, 128), dtype=jnp.float32)
    out2 = jax.block_until_ready(sinusoidal_encoding(x2))
    assert jnp.allclose(out2, _reference(x2), atol=1e-3, rtol=1e-3)

    # Larger lane-dense case: multi-step grid, donated input alias.
    x3 = jax.random.normal(jax.random.PRNGKey(0), (256, 8, 256), dtype=jnp.float32)
    out3 = jax.block_until_ready(sinusoidal_encoding(x3, donate_x=True))
    assert jnp.allclose(out3, _reference(x3), atol=1e-3, rtol=1e-3)

    print("KERNEL_OK")
</pallas_src>

<mosaic_0001>
module attributes {stable_mosaic.version = 11 : i64} {
  func.func @_add_pe_kernel(%arg0: i32, %arg1: memref<8x64xf32, #tpu.memory_space<vmem>>, %arg2: memref<8x64xf32, #tpu.memory_space<vmem>>, %arg3: memref<8x64xf32, #tpu.memory_space<vmem>>) attributes {dimension_semantics = [#tpu.dimension_semantics<parallel>], iteration_bounds = array<i64: 1>, scalar_prefetch = 0 : i64, scratch_operands = 0 : i64, tpu.core_type = #tpu.core_type<tc>, window_params = [{transform_indices = @transform_0, window_bounds = array<i64: 8, 64>}, {transform_indices = @transform_1, window_bounds = array<i64: 8, 64>}, {transform_indices = @transform_2, window_bounds = array<i64: 8, 64>}]} {
    %c0 = arith.constant 0 : index
    %c0_0 = arith.constant 0 : index
    %0 = vector.load %arg1[%c0, %c0_0] : memref<8x64xf32, #tpu.memory_space<vmem>>, vector<8x64xf32>
    %c0_1 = arith.constant 0 : index
    %c0_2 = arith.constant 0 : index
    %1 = vector.load %arg2[%c0_1, %c0_2] : memref<8x64xf32, #tpu.memory_space<vmem>>, vector<8x64xf32>
    %2 = arith.addf %0, %1 : vector<8x64xf32>
    %c0_3 = arith.constant 0 : index
    %c0_4 = arith.constant 0 : index
    %3 = vector.load %arg3[%c0_3, %c0_4] : memref<8x64xf32, #tpu.memory_space<vmem>>, vector<8x64xf32>
    tpu.vector_store %arg3[%c0_3, %c0_4], %2 {strides = array<i32>} : memref<8x64xf32, #tpu.memory_space<vmem>>, vector<8x64xf32>,
    return
  }
  func.func @transform_0(%arg0: i32) -> (i32, i32) {
    %c0_i32 = arith.constant 0 : i32
    %c0_i32_0 = arith.constant 0 : i32
    return %arg0, %c0_i32 : i32, i32
  }
  func.func @transform_1(%arg0: i32) -> (i32, i32) {
    %c0_i32 = arith.constant 0 : i32
    %c0_i32_0 = arith.constant 0 : i32
    return %arg0, %c0_i32 : i32, i32
  }
  func.func @transform_2(%arg0: i32) -> (i32, i32) {
    %c0_i32 = arith.constant 0 : i32
    %c0_i32_0 = arith.constant 0 : i32
    return %arg0, %c0_i32 : i32, i32
  }
}

</mosaic_0001>

<bundles_post_ra>
// kernel: tpu_custom_call.1
= control target key start
LH: loop header
LB: loop body
LE: loop exit
PB: predicated region body
PF: predicated region fallthrough
CT: control target
= control target key end

     0   :  { %7 = vsyncpa [#allocation3], 0  ;;  %s153_s0 = inlined_call_operand.hbm [shape: f32[8,64], index: 0, kind: input, shape index: {}]   ;;  %s154_s1 = inlined_call_operand.hbm [shape: f32[8,64], index: 1, kind: input, shape index: {}]   ;;  %s155_s2 = inlined_call_operand.hbm [shape: f32[8,64], index: 2, kind: output, shape index: {}]  }
   0x1   :  { %8 = vsyncpa [#allocation6], 0 }
   0x2   :  { %9 = vsyncpa [#allocation4], 0  ;;  %s126_s9 = smov [#allocation2]   ;;  %s127_s11 = smov [#allocation5]  }
   0x3   :  { %s16_s10 = sshll.u32 %s126_s9, 4  ;;  %s26_s12 = sshll.u32 %s127_s11, 4  ;;  %s17_s10 = int_to_ptr.vmem [resolvable:$true] %s16_s10  ;;  %s27_s12 = int_to_ptr.vmem [resolvable:$true] %s26_s12 }
   0x4   :  { %s68_s13 = scalar_lea.vmem %s17_s10, 128  ;;  %p73_p1 = scmp.lt.s32.totalorder %s17_s10, %s17_s10 }
   0x5   :  { %p69_p0 = scmp.ne.s32.totalorder %s17_s10, %s68_s13  ;;  %p74_p2 = scmp.lt.s32.totalorder %s68_s13, %s68_s13 }
   0x7   :  { %p75_p3 = por %p74_p2, %p73_p1 }
   0x9   :  { %p76_p4 = pnand %p75_p3, %p69_p0 }
   0xb   :  { %79 = shalt.err (!%p76_p4)
}
   0xc   :  { %19 = dma.hbm_to_vmem [thread:$0]  %s153_s0, 128, %s17_s10, [#allocation3]  }
   0xd   :  { %s88_s16 = scalar_lea.vmem %s27_s12, 128  ;;  %p93_p6 = scmp.lt.s32.totalorder %s27_s12, %s27_s12 }
   0xe   :  { %p89_p5 = scmp.ne.s32.totalorder %s27_s12, %s88_s16  ;;  %p94_p7 = scmp.lt.s32.totalorder %s88_s16, %s88_s16 }
  0x10   :  { %p95_p8 = por %p94_p7, %p93_p6 }
  0x12   :  { %p96_p9 = pnand %p95_p8, %p89_p5 }
  0x14   :  { %99 = shalt.err (!%p96_p9)
}
  0x15   :  { %29 = dma.hbm_to_vmem [thread:$0]  %s154_s1, 128, %s27_s12, [#allocation6]  }
  0x16   :  { %120 = dma.done.wait [#allocation3], 128  }
  0x17   :  { %121 = vsyncadd [#allocation3], 4294967168 }
  0x18   :  { %122 = dma.done.wait [#allocation6], 128  }
  0x19   :  { %123 = vsyncadd [#allocation6], 4294967168  ;;  %s128_s19 = smov [#allocation7]   ;;  %v36_v0 = vld [vmem:[#allocation2] sm:$0xff]  ;;  %v37_v1 = vld [vmem:[#allocation5] sm:$0xff]  ;;  %vm39_vm0 = vcmask 523264  }
  0x1a   :  { %s47_s20 = sshll.u32 %s128_s19, 4  ;;  %v38_v2 = vadd.f32 %v37_v1, %v36_v0  ;;  %s48_s20 = int_to_ptr.vmem [resolvable:$true] %s47_s20 }
  0x1b   :  { %s100_s0 = scalar_lea.vmem %s48_s20, 128  ;;  %p105_p11 = scmp.lt.s32.totalorder %s48_s20, %s48_s20 }
  0x1c   :  { %40 = vst.msk [vmem:[#allocation7] sm:$0xff] %vm39_vm0, %v38_v2  ;;  %p101_p10 = scmp.ne.s32.totalorder %s48_s20, %s100_s0  ;;  %p106_p12 = scmp.lt.s32.totalorder %s100_s0, %s100_s0 }
  0x1e   :  { %p107_p13 = por %p106_p12, %p105_p11 }
  0x20   :  { %p108_p0 = pnand %p107_p13, %p101_p10 }
  0x22   :  { %111 = shalt.err (!%p108_p0)
}
  0x23   :  { %50 = dma.vmem_to_hbm [thread:$0]  %s48_s20, 128, %s155_s2, [#allocation4]  }
  0x24   :  { %124 = dma.done.wait [#allocation4], 128  }
  0x25   :  { %125 = vsyncadd [#allocation4], 4294967168 }
  0x26   :  { %54 = vsyncpa [#allocation3], 1 }
  0x27   :  { %55 = vsyncpa [#allocation6], 1 }
  0x28   :  { %56 = vsyncpa [#allocation4], 1 }

</bundles_post_ra>
